<compile_context>
chip_gen: v7x
topology: tpu7x:2x2x1
jax: 0.10.0
libtpu: 0.0.40
codegen_flags: <defaults>
</compile_context>

<pallas_src>
import functools

import jax
import jax.numpy as jnp
from jax.experimental import pallas as pl
from jax.experimental.pallas import tpu as pltpu


def _round_up(x, m):
    return (x + m - 1) // m * m


def _vmem_capacity_bytes():
    try:
        return int(pltpu.get_tpu_info().vmem_capacity_bytes)
    except Exception:
        return 64 * 1024 * 1024  # conservative (v7x per-TensorCore)


def adapter_kernel(x_ref, gb_ref, w1_ref, b1_ref, w2_ref, o_ref, *, eps, inv_d):
    """One row-tile of tokens: LayerNorm -> Linear -> QuickGELU -> Linear.

    x_ref : (TM, D)  input tokens
    gb_ref: (3, D)   rows = [gamma, beta, 0.7*b2]  (f32)
    w1_ref: (D, R)   bf16, (in, out) layout
    b1_ref: (1, R)   f32
    w2_ref: (R, D)   bf16, (in, out) layout, already scaled by 0.7
    """
    x = x_ref[...].astype(jnp.float32)                      # (TM, D)

    # --- LayerNorm (two-pass variance for numerical robustness) ---
    mean = jnp.sum(x, axis=-1, keepdims=True) * inv_d
    centered = x - mean
    var = jnp.sum(centered * centered, axis=-1, keepdims=True) * inv_d
    xn = centered * jax.lax.rsqrt(var + eps) * gb_ref[0:1, :] + gb_ref[1:2, :]

    # --- ln1 on the MXU: bf16 operands, f32 accumulate ---
    h = jnp.dot(xn.astype(jnp.bfloat16), w1_ref[...],
                preferred_element_type=jnp.float32)
    h = h + b1_ref[...]                                      # (1, R) broadcast

    # --- QuickGELU: x * sigmoid(1.702 * x) (f32; sigmoid runs on the EUP) ---
    h = h * jax.nn.sigmoid(1.702 * h)

    # TODO(synk): nn.Dropout(p=0.1) is identity in eval mode; train-mode
    # masking (pltpu.prng_random_bits) is not implemented here.

    # --- ln2 on the MXU (0.7 scale pre-folded into W2 and b2) ---
    out = jnp.dot(h.astype(jnp.bfloat16), w2_ref[...],
                  preferred_element_type=jnp.float32)
    out = out + gb_ref[2:3, :]

    o_ref[...] = out.astype(o_ref.dtype)


def adapter_forward(x, gamma, beta, w1, b1, w2, b2, *, eps=1e-5, scale=0.7,
                    tm=None, out_dtype=None):
    """x: (B, S, D).  Returns (B, S, D) in out_dtype (default: x.dtype)."""
    B, S, D = x.shape
    R = w1.shape[1]
    N = B * S
    out_dtype = x.dtype if out_dtype is None else out_dtype

    in_bytes = jnp.dtype(x.dtype).itemsize
    out_bytes = jnp.dtype(out_dtype).itemsize

    # Generation-aware VMEM limit: ~87.5% of physical per-core VMEM, capped
    # at 100 MiB on the 128 MiB parts (v5e/v6e); ~56 MiB on v7x.
    vmem_cap = _vmem_capacity_bytes()
    vmem_limit = min(int(vmem_cap * 0.875), 100 * 1024 * 1024)
    vmem_budget = int(vmem_limit * 0.85)

    if tm is None:
        tm = 1024 if vmem_cap >= 96 * 1024 * 1024 else 512

    # Keep >= ~8 grid steps where the token count allows, so v7x's two
    # TensorCores can both be fed via the "parallel" grid axis.
    tm = max(8, min(tm, _round_up(pl.cdiv(N, 8), 8)))

    def vmem_estimate(t, n_const_bufs):
        xin = 2 * t * D * in_bytes                 # double-buffered input tile
        xout = 2 * t * D * out_bytes               # double-buffered output tile
        wts = n_const_bufs * 2 * (D * R + R * D)   # bf16 weights
        small = n_const_bufs * 4 * (3 * D + R)     # gamma/beta/b2 + b1
        live = (3 * D + 2 * R) * t * 4             # in-kernel f32 temporaries
        return xin + xout + wts + small + live

    while tm > 8 and vmem_estimate(tm, 2) > vmem_budget:
        tm = max(8, tm // 2)
    tm = _round_up(tm, 8)
    tm = min(tm, _round_up(N, 8))
    if tm >= N:
        tm = N                                     # single full-extent block
    grid = pl.cdiv(N, tm)

    # No host-side padding and no output slice: pure reshapes only.
    x2d = x.reshape(N, D)

    # Fold gamma / beta / (0.7 * b2) into one (3, D) operand; b1 into (1, R).
    gb = jnp.stack([gamma.astype(jnp.float32),
                    beta.astype(jnp.float32),
                    (b2 * scale).astype(jnp.float32)], axis=0)
    b1p = b1.astype(jnp.float32).reshape(1, R)
    w1p = w1.astype(jnp.bfloat16)                  # (D, R)
    w2p = (w2 * scale).astype(jnp.bfloat16)        # (R, D), 0.7 folded in

    kernel = functools.partial(adapter_kernel, eps=eps, inv_d=1.0 / D)

    cost = pl.CostEstimate(
        flops=int(4 * N * D * R + 10 * N * D + 4 * N * R),
        transcendentals=int(N * R),
        bytes_accessed=int(N * D * (in_bytes + out_bytes)
                           + 2 * 2 * D * R + 4 * (3 * D + R)),
    )

    def run(single_buffer_consts):
        def const_spec(shape):
            idx = lambda i: (0,) * len(shape)
            if single_buffer_consts:
                # Block index never changes -> a second buffer is dead VMEM.
                return pl.BlockSpec(shape, idx, pipeline_mode=pl.Buffered(1))
            return pl.BlockSpec(shape, idx)

        return pl.pallas_call(
            kernel,
            out_shape=jax.ShapeDtypeStruct((N, D), out_dtype),
            grid_spec=pltpu.PrefetchScalarGridSpec(
                num_scalar_prefetch=0,
                grid=(grid,),
                in_specs=[
                    pl.BlockSpec((tm, D), lambda i: (i, 0)),   # x row tile
                    const_spec((3, D)),                        # [gamma; beta; 0.7*b2]
                    const_spec((D, R)),                        # W1 (in, out) bf16
                    const_spec((1, R)),                        # b1
                    const_spec((R, D)),                        # 0.7*W2 (in, out) bf16
                ],
                out_specs=pl.BlockSpec((tm, D), lambda i: (i, 0)),
            ),
            compiler_params=pltpu.CompilerParams(
                dimension_semantics=("parallel",),
                vmem_limit_bytes=vmem_limit),
            cost_estimate=cost,
        )(x2d, gb, w1p, b1p, w2p)

    try:
        out2d = run(single_buffer_consts=True)
    except Exception:
        # pipeline_mode=pl.Buffered(1) unsupported on this jax version;
        # fall back to default double-buffered constant operands.
        out2d = run(single_buffer_consts=False)

    return out2d.reshape(B, S, D)


def adapter_reference(x, gamma, beta, w1, b1, w2, b2, *, eps=1e-5, scale=0.7):
    """Pure-JAX f32 reference of the PyTorch forward (eval mode)."""
    xf = x.astype(jnp.float32)
    mean = jnp.mean(xf, axis=-1, keepdims=True)
    var = jnp.mean((xf - mean) ** 2, axis=-1, keepdims=True)
    xn = (xf - mean) * jax.lax.rsqrt(var + eps) * gamma + beta
    h = xn @ w1 + b1
    h = h * jax.nn.sigmoid(1.702 * h)
    out = h @ w2 + b2
    return out * scale


def init_params(key, embed_dims, reduction_dims):
    """Deterministic init mimicking the module's init_weights:
    kaiming_uniform_(a=sqrt(5)) on Linear weights -> U(-1/sqrt(fan_in), +...),
    normal(std=1e-6) on Linear biases; LayerNorm gamma=1, beta=0."""
    k1, k2, k3, k4 = jax.random.split(key, 4)
    D, R = embed_dims, reduction_dims
    bound1 = 1.0 / jnp.sqrt(jnp.float32(D))   # ln1 fan_in = D
    bound2 = 1.0 / jnp.sqrt(jnp.float32(R))   # ln2 fan_in = R
    # Stored pre-transposed as (in, out).
    w1 = jax.random.uniform(k1, (D, R), jnp.float32, -bound1, bound1)
    b1 = 1e-6 * jax.random.normal(k2, (R,), jnp.float32)
    w2 = jax.random.uniform(k3, (R, D), jnp.float32, -bound2, bound2)
    b2 = 1e-6 * jax.random.normal(k4, (D,), jnp.float32)
    gamma = jnp.ones((D,), jnp.float32)
    beta = jnp.zeros((D,), jnp.float32)
    return gamma, beta, w1, b1, w2, b2


if __name__ == "__main__":
    key = jax.random.PRNGKey(0)
    kx, kp = jax.random.split(key)

    batch, seq, embed_dims, reduction_dims = 2, 8, 32, 16
    x = jax.random.normal(kx, (batch, seq, embed_dims), jnp.float32)
    gamma, beta, w1, b1, w2, b2 = init_params(kp, embed_dims, reduction_dims)

    ref = adapter_reference(x, gamma, beta, w1, b1, w2, b2)

    # f32 activation I/O (matches the PyTorch module exactly).
    out = adapter_forward(x, gamma, beta, w1, b1, w2, b2)
    out = jax.block_until_ready(out)
    assert out.shape == (batch, seq, embed_dims)
    assert out.dtype == x.dtype
    # bf16 MXU operands (f32 accumulate) -> compare to f32 ref with a loose tol.
    assert jnp.allclose(out, ref, atol=2e-2, rtol=2e-2), "mismatch (f32 I/O)"

    # bf16 activation I/O path (halves the dominant HBM stream).
    out_bf16 = adapter_forward(x.astype(jnp.bfloat16), gamma, beta,
                               w1, b1, w2, b2, out_dtype=jnp.bfloat16)
    out_bf16 = jax.block_until_ready(out_bf16)
    assert out_bf16.dtype == jnp.bfloat16
    assert jnp.allclose(out_bf16.astype(jnp.float32), ref,
                        atol=6e-2, rtol=6e-2), "mismatch (bf16 I/O)"

    print("KERNEL_OK")
</pallas_src>

<mosaic_0001>
module attributes {stable_mosaic.version = 11 : i64} {
  func.func @adapter_kernel(%arg0: i32, %arg1: memref<8x32xf32, #tpu.memory_space<vmem>>, %arg2: memref<3x32xf32, #tpu.memory_space<vmem>>, %arg3: memref<32x16xbf16, #tpu.memory_space<vmem>>, %arg4: memref<1x16xf32, #tpu.memory_space<vmem>>, %arg5: memref<16x32xbf16, #tpu.memory_space<vmem>>, %arg6: memref<8x32xf32, #tpu.memory_space<vmem>>) attributes {dimension_semantics = [#tpu.dimension_semantics<parallel>], iteration_bounds = array<i64: 2>, scalar_prefetch = 0 : i64, scratch_operands = 0 : i64, tpu.core_type = #tpu.core_type<tc>, window_params = [{transform_indices = @transform_0, window_bounds = array<i64: 8, 32>}, {pipeline_mode = #tpu.pipeline_mode<synchronous>, transform_indices = @transform_1, window_bounds = array<i64: 3, 32>}, {pipeline_mode = #tpu.pipeline_mode<synchronous>, transform_indices = @transform_2, window_bounds = array<i64: 32, 16>}, {pipeline_mode = #tpu.pipeline_mode<synchronous>, transform_indices = @transform_3, window_bounds = array<i64: 1, 16>}, {pipeline_mode = #tpu.pipeline_mode<synchronous>, transform_indices = @transform_4, window_bounds = array<i64: 16, 32>}, {transform_indices = @transform_5, window_bounds = array<i64: 8, 32>}]} {
    %c0 = arith.constant 0 : index
    %c0_0 = arith.constant 0 : index
    %0 = vector.load %arg1[%c0, %c0_0] : memref<8x32xf32, #tpu.memory_space<vmem>>, vector<8x32xf32>
    %cst = arith.constant dense<0.000000e+00> : vector<8xf32>
    %1 = vector.multi_reduction <add>, %0, %cst [1] : vector<8x32xf32> to vector<8xf32>
    %2 = vector.shape_cast %1 : vector<8xf32> to vector<8x1xf32>
    %cst_1 = arith.constant 3.125000e-02 : f32
    %3 = vector.broadcast %cst_1 : f32 to vector<8x1xf32>
    %4 = arith.mulf %2, %3 : vector<8x1xf32>
    %5 = vector.broadcast %4 : vector<8x1xf32> to vector<8x32xf32>
    %6 = arith.subf %0, %5 : vector<8x32xf32>
    %7 = arith.mulf %6, %6 : vector<8x32xf32>
    %cst_2 = arith.constant dense<0.000000e+00> : vector<8xf32>
    %8 = vector.multi_reduction <add>, %7, %cst_2 [1] : vector<8x32xf32> to vector<8xf32>
    %9 = vector.shape_cast %8 : vector<8xf32> to vector<8x1xf32>
    %cst_3 = arith.constant 3.125000e-02 : f32
    %10 = vector.broadcast %cst_3 : f32 to vector<8x1xf32>
    %11 = arith.mulf %9, %10 : vector<8x1xf32>
    %cst_4 = arith.constant 9.99999974E-6 : f32
    %12 = vector.broadcast %cst_4 : f32 to vector<8x1xf32>
    %13 = arith.addf %11, %12 : vector<8x1xf32>
    %14 = math.rsqrt %13 : vector<8x1xf32>
    %15 = vector.broadcast %14 : vector<8x1xf32> to vector<8x32xf32>
    %16 = arith.mulf %6, %15 : vector<8x32xf32>
    %c0_5 = arith.constant 0 : index
    %c0_6 = arith.constant 0 : index
    %17 = vector.load %arg2[%c0_5, %c0_6] : memref<3x32xf32, #tpu.memory_space<vmem>>, vector<1x32xf32>
    %18 = vector.broadcast %17 : vector<1x32xf32> to vector<8x32xf32>
    %19 = arith.mulf %16, %18 : vector<8x32xf32>
    %c1 = arith.constant 1 : index
    %c0_7 = arith.constant 0 : index
    %20 = vector.load %arg2[%c1, %c0_7] : memref<3x32xf32, #tpu.memory_space<vmem>>, vector<1x32xf32>
    %21 = vector.broadcast %20 : vector<1x32xf32> to vector<8x32xf32>
    %22 = arith.addf %19, %21 : vector<8x32xf32>
    %23 = arith.truncf %22 : vector<8x32xf32> to vector<8x32xbf16>
    %c0_8 = arith.constant 0 : index
    %c0_9 = arith.constant 0 : index
    %24 = vector.load %arg3[%c0_8, %c0_9] : memref<32x16xbf16, #tpu.memory_space<vmem>>, vector<32x16xbf16>
    %cst_10 = arith.constant dense<0.000000e+00> : vector<8x16xf32>
    %25 = tpu.matmul %23, %24, %cst_10 {dimension_numbers = #tpu.dot_dimension_numbers<[1], [0], [0], [1], [0, 0, 1, 1], [], []>} : vector<8x32xbf16>, vector<32x16xbf16>, vector<8x16xf32> -> vector<8x16xf32>
    %c0_11 = arith.constant 0 : index
    %c0_12 = arith.constant 0 : index
    %26 = vector.load %arg4[%c0_11, %c0_12] : memref<1x16xf32, #tpu.memory_space<vmem>>, vector<1x16xf32>
    %27 = vector.broadcast %26 : vector<1x16xf32> to vector<8x16xf32>
    %28 = arith.addf %25, %27 : vector<8x16xf32>
    %cst_13 = arith.constant 1.702000e+00 : f32
    %29 = vector.broadcast %cst_13 : f32 to vector<8x16xf32>
    %30 = arith.mulf %29, %28 : vector<8x16xf32>
    %31 = arith.negf %30 : vector<8x16xf32>
    %32 = math.exp %31 : vector<8x16xf32>
    %cst_14 = arith.constant 1.000000e+00 : f32
    %33 = vector.broadcast %cst_14 : f32 to vector<8x16xf32>
    %34 = arith.addf %33, %32 : vector<8x16xf32>
    %35 = arith.divf %33, %34 : vector<8x16xf32>
    %36 = arith.mulf %28, %35 : vector<8x16xf32>
    %37 = arith.truncf %36 : vector<8x16xf32> to vector<8x16xbf16>
    %c0_15 = arith.constant 0 : index
    %c0_16 = arith.constant 0 : index
    %38 = vector.load %arg5[%c0_15, %c0_16] : memref<16x32xbf16, #tpu.memory_space<vmem>>, vector<16x32xbf16>
    %cst_17 = arith.constant dense<0.000000e+00> : vector<8x32xf32>
    %39 = tpu.matmul %37, %38, %cst_17 {dimension_numbers = #tpu.dot_dimension_numbers<[1], [0], [0], [1], [0, 0, 1, 1], [], []>} : vector<8x16xbf16>, vector<16x32xbf16>, vector<8x32xf32> -> vector<8x32xf32>
    %c2 = arith.constant 2 : index
    %c0_18 = arith.constant 0 : index
    %40 = vector.load %arg2[%c2, %c0_18] : memref<3x32xf32, #tpu.memory_space<vmem>>, vector<1x32xf32>
    %41 = vector.broadcast %40 : vector<1x32xf32> to vector<8x32xf32>
    %42 = arith.addf %39, %41 : vector<8x32xf32>
    %c0_19 = arith.constant 0 : index
    %c0_20 = arith.constant 0 : index
    %43 = vector.load %arg6[%c0_19, %c0_20] : memref<8x32xf32, #tpu.memory_space<vmem>>, vector<8x32xf32>
    tpu.vector_store %arg6[%c0_19, %c0_20], %42 {strides = array<i32>} : memref<8x32xf32, #tpu.memory_space<vmem>>, vector<8x32xf32>,
    return
  }
  func.func @transform_0(%arg0: i32) -> (i32, i32) {
    %c0_i32 = arith.constant 0 : i32
    %c0_i32_0 = arith.constant 0 : i32
    return %arg0, %c0_i32 : i32, i32
  }
  func.func @transform_1(%arg0: i32) -> (i32, i32) {
    %c0_i32 = arith.constant 0 : i32
    %c0_i32_0 = arith.constant 0 : i32
    %c0_i32_1 = arith.constant 0 : i32
    return %c0_i32, %c0_i32_0 : i32, i32
  }
  func.func @transform_2(%arg0: i32) -> (i32, i32) {
    %c0_i32 = arith.constant 0 : i32
    %c0_i32_0 = arith.constant 0 : i32
    %c0_i32_1 = arith.constant 0 : i32
    return %c0_i32, %c0_i32_0 : i32, i32
  }
  func.func @transform_3(%arg0: i32) -> (i32, i32) {
    %c0_i32 = arith.constant 0 : i32
    %c0_i32_0 = arith.constant 0 : i32
    %c0_i32_1 = arith.constant 0 : i32
    return %c0_i32, %c0_i32_0 : i32, i32
  }
  func.func @transform_4(%arg0: i32) -> (i32, i32) {
    %c0_i32 = arith.constant 0 : i32
    %c0_i32_0 = arith.constant 0 : i32
    %c0_i32_1 = arith.constant 0 : i32
    return %c0_i32, %c0_i32_0 : i32, i32
  }
  func.func @transform_5(%arg0: i32) -> (i32, i32) {
    %c0_i32 = arith.constant 0 : i32
    %c0_i32_0 = arith.constant 0 : i32
    return %arg0, %c0_i32 : i32, i32
  }
}

module attributes {stable_mosaic.version = 11 : i64} {
  func.func @adapter_kernel(%arg0: i32, %arg1: memref<8x32xf32, #tpu.memory_space<vmem>>, %arg2: memref<3x32xf32, #tpu.memory_space<vmem>>, %arg3: memref<32x16xbf16, #tpu.memory_space<vmem>>, %arg4: memref<1x16xf32, #tpu.memory_space<vmem>>, %arg5: memref<16x32xbf16, #tpu.memory_space<vmem>>, %arg6: memref<8x32xf32, #tpu.memory_space<vmem>>) attributes {dimension_semantics = [#tpu.dimension_semantics<parallel>], iteration_bounds = array<i64: 2>, scalar_prefetch = 0 : i64, scratch_operands = 0 : i64, tpu.core_type = #tpu.core_type<tc>, window_params = [{transform_indices = @transform_0, window_bounds = array<i64: 8, 32>}, {pipeline_mode = #tpu.pipeline_mode<synchronous>, transform_indices = @transform_1, window_bounds = array<i64: 3, 32>}, {pipeline_mode = #tpu.pipeline_mode<synchronous>, transform_indices = @transform_2, window_bounds = array<i64: 32, 16>}, {pipeline_mode = #tpu.pipeline_mode<synchronous>, transform_indices = @transform_3, window_bounds = array<i64: 1, 16>}, {pipeline_mode = #tpu.pipeline_mode<synchronous>, transform_indices = @transform_4, window_bounds = array<i64: 16, 32>}, {transform_indices = @transform_5, window_bounds = array<i64: 8, 32>}]} {
    %c0 = arith.constant 0 : index
    %c0_0 = arith.constant 0 : index
    %0 = vector.load %arg1[%c0, %c0_0] : memref<8x32xf32, #tpu.memory_space<vmem>>, vector<8x32xf32>
    %cst = arith.constant dense<0.000000e+00> : vector<8xf32>
    %1 = vector.multi_reduction <add>, %0, %cst [1] : vector<8x32xf32> to vector<8xf32>
    %2 = vector.shape_cast %1 : vector<8xf32> to vector<8x1xf32>
    %cst_1 = arith.constant 3.125000e-02 : f32
    %3 = vector.broadcast %cst_1 : f32 to vector<8x1xf32>
    %4 = arith.mulf %2, %3 : vector<8x1xf32>
    %5 = vector.broadcast %4 : vector<8x1xf32> to vector<8x32xf32>
    %6 = arith.subf %0, %5 : vector<8x32xf32>
    %7 = arith.mulf %6, %6 : vector<8x32xf32>
    %cst_2 = arith.constant dense<0.000000e+00> : vector<8xf32>
    %8 = vector.multi_reduction <add>, %7, %cst_2 [1] : vector<8x32xf32> to vector<8xf32>
    %9 = vector.shape_cast %8 : vector<8xf32> to vector<8x1xf32>
    %cst_3 = arith.constant 3.125000e-02 : f32
    %10 = vector.broadcast %cst_3 : f32 to vector<8x1xf32>
    %11 = arith.mulf %9, %10 : vector<8x1xf32>
    %cst_4 = arith.constant 9.99999974E-6 : f32
    %12 = vector.broadcast %cst_4 : f32 to vector<8x1xf32>
    %13 = arith.addf %11, %12 : vector<8x1xf32>
    %14 = math.rsqrt %13 : vector<8x1xf32>
    %15 = vector.broadcast %14 : vector<8x1xf32> to vector<8x32xf32>
    %16 = arith.mulf %6, %15 : vector<8x32xf32>
    %c0_5 = arith.constant 0 : index
    %c0_6 = arith.constant 0 : index
    %17 = vector.load %arg2[%c0_5, %c0_6] : memref<3x32xf32, #tpu.memory_space<vmem>>, vector<1x32xf32>
    %18 = vector.broadcast %17 : vector<1x32xf32> to vector<8x32xf32>
    %19 = arith.mulf %16, %18 : vector<8x32xf32>
    %c1 = arith.constant 1 : index
    %c0_7 = arith.constant 0 : index
    %20 = vector.load %arg2[%c1, %c0_7] : memref<3x32xf32, #tpu.memory_space<vmem>>, vector<1x32xf32>
    %21 = vector.broadcast %20 : vector<1x32xf32> to vector<8x32xf32>
    %22 = arith.addf %19, %21 : vector<8x32xf32>
    %23 = arith.truncf %22 : vector<8x32xf32> to vector<8x32xbf16>
    %c0_8 = arith.constant 0 : index
    %c0_9 = arith.constant 0 : index
    %24 = vector.load %arg3[%c0_8, %c0_9] : memref<32x16xbf16, #tpu.memory_space<vmem>>, vector<32x16xbf16>
    %cst_10 = arith.constant dense<0.000000e+00> : vector<8x16xf32>
    %25 = tpu.matmul %23, %24, %cst_10 {dimension_numbers = #tpu.dot_dimension_numbers<[1], [0], [0], [1], [0, 0, 1, 1], [], []>} : vector<8x32xbf16>, vector<32x16xbf16>, vector<8x16xf32> -> vector<8x16xf32>
    %c0_11 = arith.constant 0 : index
    %c0_12 = arith.constant 0 : index
    %26 = vector.load %arg4[%c0_11, %c0_12] : memref<1x16xf32, #tpu.memory_space<vmem>>, vector<1x16xf32>
    %27 = vector.broadcast %26 : vector<1x16xf32> to vector<8x16xf32>
    %28 = arith.addf %25, %27 : vector<8x16xf32>
    %cst_13 = arith.constant 1.702000e+00 : f32
    %29 = vector.broadcast %cst_13 : f32 to vector<8x16xf32>
    %30 = arith.mulf %29, %28 : vector<8x16xf32>
    %31 = arith.negf %30 : vector<8x16xf32>
    %32 = math.exp %31 : vector<8x16xf32>
    %cst_14 = arith.constant 1.000000e+00 : f32
    %33 = vector.broadcast %cst_14 : f32 to vector<8x16xf32>
    %34 = arith.addf %33, %32 : vector<8x16xf32>
    %35 = arith.divf %33, %34 : vector<8x16xf32>
    %36 = arith.mulf %28, %35 : vector<8x16xf32>
    %37 = arith.truncf %36 : vector<8x16xf32> to vector<8x16xbf16>
    %c0_15 = arith.constant 0 : index
    %c0_16 = arith.constant 0 : index
    %38 = vector.load %arg5[%c0_15, %c0_16] : memref<16x32xbf16, #tpu.memory_space<vmem>>, vector<16x32xbf16>
    %cst_17 = arith.constant dense<0.000000e+00> : vector<8x32xf32>
    %39 = tpu.matmul %37, %38, %cst_17 {dimension_numbers = #tpu.dot_dimension_numbers<[1], [0], [0], [1], [0, 0, 1, 1], [], []>} : vector<8x16xbf16>, vector<16x32xbf16>, vector<8x32xf32> -> vector<8x32xf32>
    %c2 = arith.constant 2 : index
    %c0_18 = arith.constant 0 : index
    %40 = vector.load %arg2[%c2, %c0_18] : memref<3x32xf32, #tpu.memory_space<vmem>>, vector<1x32xf32>
    %41 = vector.broadcast %40 : vector<1x32xf32> to vector<8x32xf32>
    %42 = arith.addf %39, %41 : vector<8x32xf32>
    %c0_19 = arith.constant 0 : index
    %c0_20 = arith.constant 0 : index
    %43 = vector.load %arg6[%c0_19, %c0_20] : memref<8x32xf32, #tpu.memory_space<vmem>>, vector<8x32xf32>
    tpu.vector_store %arg6[%c0_19, %c0_20], %42 {strides = array<i32>} : memref<8x32xf32, #tpu.memory_space<vmem>>, vector<8x32xf32>,
    return
  }
  func.func @transform_0(%arg0: i32) -> (i32, i32) {
    %c0_i32 = arith.constant 0 : i32
    %c0_i32_0 = arith.constant 0 : i32
    return %arg0, %c0_i32 : i32, i32
  }
  func.func @transform_1(%arg0: i32) -> (i32, i32) {
    %c0_i32 = arith.constant 0 : i32
    %c0_i32_0 = arith.constant 0 : i32
    %c0_i32_1 = arith.constant 0 : i32
    return %c0_i32, %c0_i32_0 : i32, i32
  }
  func.func @transform_2(%arg0: i32) -> (i32, i32) {
    %c0_i32 = arith.constant 0 : i32
    %c0_i32_0 = arith.constant 0 : i32
    %c0_i32_1 = arith.constant 0 : i32
    return %c0_i32, %c0_i32_0 : i32, i32
  }
  func.func @transform_3(%arg0: i32) -> (i32, i32) {
    %c0_i32 = arith.constant 0 : i32
    %c0_i32_0 = arith.constant 0 : i32
    %c0_i32_1 = arith.constant 0 : i32
    return %c0_i32, %c0_i32_0 : i32, i32
  }
  func.func @transform_4(%arg0: i32) -> (i32, i32) {
    %c0_i32 = arith.constant 0 : i32
    %c0_i32_0 = arith.constant 0 : i32
    %c0_i32_1 = arith.constant 0 : i32
    return %c0_i32, %c0_i32_0 : i32, i32
  }
  func.func @transform_5(%arg0: i32) -> (i32, i32) {
    %c0_i32 = arith.constant 0 : i32
    %c0_i32_0 = arith.constant 0 : i32
    return %arg0, %c0_i32 : i32, i32
  }
}

</mosaic_0001>

<bundles_post_ra>
// kernel: tpu_custom_call.1
= control target key start
LH: loop header
LB: loop body
LE: loop exit
PB: predicated region body
PF: predicated region fallthrough
CT: control target
= control target key end

     0   :  { %10 = vsyncpa [#allocation3], 0  ;;  %s863_s0 = inlined_call_operand.vmem [shape: f32[16,32], index: 0, kind: input, shape index: {}]   ;;  %s864_s1 = inlined_call_operand.hbm [shape: f32[3,32], index: 1, kind: input, shape index: {}]   ;;  %s865_s2 = inlined_call_operand.vmem [shape: bf16[32,16], index: 2, kind: input, shape index: {}]   ;;  %s866_s3 = inlined_call_operand.vmem [shape: f32[1,16], index: 3, kind: input, shape index: {}]   ;;  %s867_s4 = inlined_call_operand.vmem [shape: bf16[16,32], index: 4, kind: input, shape index: {}]   ;;  %s868_s5 = inlined_call_operand.hbm [shape: f32[16,32], index: 5, kind: output, shape index: {}]  }
   0x1   :  { %11 = vsyncpa [#allocation4], 0 }
   0x2   :  { %13 = vsyncpa [#allocation4 + $0x1], 0  ;;  %s712_s18 = smov 0   ;;  %s714_s19 = smov 0  }
   0x3   :  { %s716_s20 = smov 0   ;;  %s718_s21 = smov 0  }
   0x4 LB: > { %s733_s22 = sadd.s32 4294967295, %s676_s21   ;;  %s480_s23 = sadd.s32 4294967294, %s676_s21   ;;  %s676_s21 = sphi %s718_s21, %s884_s21   ;;  %s672_s20 = sphi %s716_s20, %s883_s20   ;;  %s668_s19 = sphi %s714_s19, %s882_s19   ;;  %s664_s18 = sphi %s712_s18, %s881_s18  }
   0x5   : > { %s737_s24 = sadd.s32 1, %s676_s21   ;;  %s136_s25 = sadd.s32 1, %s672_s20 }
   0x6   : > { %s133_s26 = ssub.s32 %s676_s21, %s737_s24  ;;  %p146_p0 = scmp.ne.s32.totalorder %s672_s20, %s668_s19 }
   0x7   : > { %p134_p1 = scmp.eq.s32.totalorder %s133_s26, 0  ;;  %p147_p2 = scmp.eq.s32.totalorder %s733_s22, 1 }
   0x8   : > { %p152_p3 = scmp.ne.s32.totalorder %s668_s19, %s664_s18  ;;  %p153_p4 = scmp.eq.s32.totalorder %s480_s23, 1 }
   0x9   : > { %s748_s27 = scalar_select %p134_p1, %s672_s20, %s136_s25  }
   0xa   : > { %p750_p5 = por %p147_p2, %p146_p0  ;;  %p754_p6 = por %p153_p4, %p152_p3 }
   0xb   : > { %p481_p7 = scmp.ge.s32.totalorder %s676_s21, 1  ;;  %p160_p8 = scmp.lt.s32.totalorder %s676_s21, 3 }
   0xc   : > { %s872_s28 = scalar_select %p750_p5, 1, 0 }
   0xd   : > { %s873_s29 = scalar_select %p754_p6, 1, 0 }
   0xe   : > { %p869_p9 = scmp.eq.s32.totalorder %s733_s22, 0  ;;  %p761_p10 = pnand %p481_p7, %p160_p8 }
   0xf   : > { %s678_s6 = smov [#allocation2]   ;;  %s582_s11 = scalar_lea.hbm %s864_s1, 64 }
  0x10   : > { %s874_s30 = scalar_select %p761_p10, 1, 0 }
  0x11   : > { %s173_s7 = sshll.u32 %s678_s6, 4  ;;  %p527_p11 = pneg %p761_p10  ;;  %s174_s7 = int_to_ptr.vmem [resolvable:$true] %s173_s7 }
  0x12   : > { %p583_p13 = scmp.ne.s32.totalorder %s864_s1, %s582_s11  ;;  %p589_p3 = scmp.lt.u32.totalorder %s582_s11, %s864_s1 }
  0x13   : > { %p769_p12 = pnand %p869_p9, %p527_p11 }
  0x15   : > { %p584_p0 = pneg %p769_p12 }
  0x17   : > { %p585_p1 = pnand %p584_p0, %p583_p13 }
  0x19   : > { %p586_p2 = pneg %p585_p1 }
  0x1b   : > { %p591_p4 = pnand %p589_p3, %p586_p2 }
  0x1d   : > { %594 = shalt.err (!%p591_p4)
}
  0x1e   : > { %s595_s16 = scalar_lea.vmem %s174_s7, 64  ;;  %p603_p9 = scmp.lt.s32.totalorder %s174_s7, %s174_s7 }
  0x1f   : > { %p596_p7 = scmp.ne.s32.totalorder %s174_s7, %s595_s16  ;;  %p604_p6 = scmp.lt.s32.totalorder %s595_s16, %s595_s16 }
  0x21   : > { %p598_p8 = pnand %p596_p7, %p584_p0  ;;  %p605_p5 = por %p604_p6, %p603_p9 }
  0x23   : > { %p599_p11 = pneg %p598_p8 }
  0x25   : > { %p606_p10 = pnand %p605_p5, %p599_p11 }
  0x27   : > { %609 = shalt.err (!%p606_p10)
}
  0x28   : > { %530 = dma.hbm_to_vmem [thread:$0]  (!%p769_p12), %s864_s1, 64, %s174_s7, [#allocation3]  }
  0x29   : > { %p876_p13 = scmp.ne.s32.totalorder %s874_s30, 0 }
  0x2a   : > { %p877_p1 = scmp.eq.s32.totalorder (!%p876_p13), %s733_s22, 0 }
  0x2b   : > { %202 = sbr.rel (%p876_p13) target bundleno = 847 (0x34f), region = 40 }
  0x32   : > { %655 = dma.done.wait (%p877_p1), [#allocation3], 64   ;;  %p878_p0 = pmov %p877_p1 }
  0x33   : > { %p229_p6 = scmp.lt.s32.totalorder %s733_s22, 1  ;;  %vm235_vm0 = vcmask 261120   ;;  %v573_v7 = vld [vmem:[%s865_s2] sm:$0xff]   ;;  %v679_v8 = vmov 0.0   ;;  %v574_v9 = vld [vmem:[%s865_s2 + $0x8] sm:$0xff]   ;;  %vm680_vm1 = vmmov 0  }
  0x34   : > { %657 = vsyncadd (%p878_p0), [#allocation3], 4294967232  ;;  %507 = vmatprep.subr.bf16.mxu0 %v679_v8  ;;  %515 = vmatprep.subr.bf16.mxu1 %v679_v8  ;;  %v488_v14 = vld [vmem:[#allocation2] ss:$0 sm:$0xff]  ;;  %v489_v16 = vld [vmem:[#allocation2 + $0x1] ss:$0 sm:$0xff] }
  0x35   : > { %s230_s25 = scalar_select %p229_p6, %s733_s22, 1  ;;  %508 = vmatpush3.bf16.msra.mxu0 %v573_v7  ;;  %511 = vmatprep.mubr.msk.bf16.mxu0 %vm680_vm1, %v679_v8  ;;  %v575_v20 = vld [vmem:[%s867_s4] sm:$0xff]   ;;  %vm350_vm2 = vcmask 130048  }
  0x36   : > { %509 = vmatprep.subr.bf16.mxu0 %v679_v8  ;;  %517 = vmatprep.mubr.msk.bf16.mxu1 %vm680_vm1, %v679_v8  ;;  %v490_v21 = vld [vmem:[%s866_s3] ss:$0 sm:$0xff]  ;;  %s226_s16 = sand.u32 1, %s668_s19   ;;  %v495_v34 = vld [vmem:[#allocation2 + $0x2] ss:$0 sm:$0xff]  ;;  %s499_s23 = sshll.u32 %s733_s22, 7 }
  0x37   : > { %s487_s26 = sshll.u32 %s230_s25, 3  ;;  %516 = vmatpush3.bf16.msra.mxu1 %v575_v20  ;;  %s486_s17 = sshll.u32 %s226_s16, 3 }
  0x38   : > { %s232_s9 = scalar_lea.vmem %s863_s0, %s487_s26  ;;  %s228_s25 = scalar_lea.vmem [#allocation5], %s486_s17 }
  0x39   : > { %v234_v0 = vld [vmem:[%s232_s9] sm:$0xff]  ;;  %510 = vmatpush3.bf16.msra.mxu0 %v574_v9  ;;  %s409_s26 = sshll.u32 %s228_s25, 4  ;;  %s820_s9 = scalar_lea.hbm %s868_s5, %s499_s23  ;;  %s822_s26 = int_to_ptr.vmem [resolvable:$true] %s409_s26 }
  0x3a   : > { %v236_v1 = vsel %vm235_vm0, %v234_v0, 0.0  ;;  %s396_s22 = scalar_lea.sflag [#allocation4], %s226_s16  ;;  %s610_s30 = scalar_lea.vmem %s822_s26, 128 }
  0x3b   : > { %237 = vadd.xlane.f32.xlu0 %v236_v1  ;;  %p611_p5 = scmp.ne.s32.totalorder %s822_s26, %s610_s30  ;;  %p879_p9 = scmp.ne.s32.totalorder %s872_s28, 0 }
  0x3c   : > { %s681_s7 = smov [#allocation5]  }
  0x3d   : > { %p612_p10 = pnand %p611_p5, %p879_p9  ;;  %s614_s10 = sshll.u32 %s681_s7, 4  ;;  %s615_s10 = int_to_ptr.vmem [resolvable:$false] %s614_s10 }
  0x3e   : > { %s616_s11 = scalar_lea.vmem %s615_s10, 256  ;;  %p617_p2 = scmp.lt.s32.totalorder %s822_s26, %s615_s10 }
  0x3f   : > { %p613_p12 = pneg %p612_p10  ;;  %p618_p3 = scmp.lt.s32.totalorder %s616_s11, %s610_s30 }
  0x41   : > { %p619_p4 = por %p618_p3, %p617_p2 }
  0x43   : > { %p620_p7 = pnand %p619_p4, %p613_p12 }
  0xc8   : > { %v238_v2 = vpop.xlane.xlu0 %237 }
  0xc9   : > { %v239_v3 = vmul.f32 0.03125, %v238_v2 }
  0xcb   : > { %v240_v4 = vsub.f32 %v234_v0, %v239_v3 }
  0xcd   : > { %v241_v5 = vmul.f32 %v240_v4, %v240_v4 }
  0xcf   : > { %v242_v6 = vsel %vm235_vm0, %v241_v5, 0.0 }
  0xd0   : > { %243 = vadd.xlane.f32.xlu0 %v242_v6 }
 0x15d   : > { %v244_v10 = vpop.xlane.xlu0 %243 }
 0x15e   : > { %v245_v11 = vmul.f32 0.03125, %v244_v10 }
 0x160   : > { %v246_v12 = vadd.f32 1e-05, %v245_v11 }
 0x162   : > { %576 = vrsqrt.f32 %v246_v12 }
 0x16c   : > { %v577_v13 = vpop.eup %576 }
 0x16d   : > { %v248_v15 = vmul.f32 %v577_v13, %v240_v4 }
 0x16f   : > { %v254_v17 = vmul.f32 %v488_v14, %v248_v15 }
 0x171   : > { %v260_v18 = vadd.f32 %v489_v16, %v254_v17 }
 0x173   : > { %v261_v19 = vpack.c.bf16 %v260_v18, %v260_v18 }
 0x175   : > { %512 = vmatmul.mubr.msk.bf16.vlgmr.msra.gmra.mrb[0].mxu0 %vm235_vm0, %v261_v19 }
 0x248   : > { %v322_v22 = vpop.f32.mrb[0].mxu0 }
 0x249   : > { %v323_v23 = vadd.f32 %v490_v21, %v322_v22  ;;  %v513_v24 = vpop.f32.mrb[1].mxu0 }
 0x24a   : > { %v325_v25 = vpop.f32.mrb[2].mxu0 }
 0x24b   : > { %v494_v26 = vmul.f32 -1.702, %v323_v23  ;;  %v514_v27 = vpop.f32.mrb[3].mxu0 }
 0x24d   : > { %v330_v28 = vmul.f32 1.442695, %v494_v26 }
 0x24f   : > { %578 = vpow2.f32 %v330_v28 }
 0x259   : > { %v579_v29 = vpop.eup %578 }
 0x25a   : > { %v332_v30 = vadd.f32 1.0, %v579_v29 }
 0x25c   : > { %580 = vrcp.f32 %v332_v30 }
 0x266   : > { %v581_v31 = vpop.eup %580 }
 0x267   : > { %v335_v32 = vmul.f32 %v581_v31, %v323_v23 }
 0x269   : > { %v336_v33 = vpack.c.bf16 %v335_v32, %v335_v32 }
 0x26b   : > { %518 = vmatmul.mubr.msk.bf16.vlgmr.msra.gmra.mrb[0].mxu1 %vm350_vm2, %v336_v33 }
 0x33e   : > { %v388_v35 = vpop.f32.mrb[0].mxu1 }
 0x33f   : > { %v389_v36 = vadd.f32 %v495_v34, %v388_v35  ;;  %v519_v37 = vpop.f32.mrb[1].mxu1 }
 0x340   : > { %v391_v38 = vpop.f32.mrb[2].mxu1 }
 0x341   : > { %v520_v39 = vpop.f32.mrb[3].mxu1  ;;  %394 = vst.msk [vmem:[%s228_s25] sm:$0xff] %vm235_vm0, %v389_v36 }
 0x342   : > { %623 = shalt.err (!%p620_p7)
}
 0x343   : > { %s624_s12 = scalar_lea.hbm %s820_s9, 128  ;;  %s628_s15 = scalar_lea.hbm %s868_s5, 256 }
 0x344   : > { %p625_p8 = scmp.ne.s32.totalorder %s820_s9, %s624_s12  ;;  %p629_p1 = scmp.lt.u32.totalorder %s820_s9, %s868_s5 }
 0x345   : > { %p630_p0 = scmp.lt.u32.totalorder %s628_s15, %s624_s12  ;;  %p632_p5 = scmp.lt.u32.totalorder %s624_s12, %s820_s9 }
 0x346   : > { %p626_p11 = pnand %p625_p8, %p879_p9 }
 0x347   : > { %p631_p6 = por %p630_p0, %p629_p1 }
 0x348   : > { %p627_p13 = pneg %p626_p11 }
 0x349   : > { %p633_p10 = por %p632_p5, %p631_p6 }
 0x34b   : > { %p634_p12 = pnand %p633_p10, %p627_p13 }
 0x34d   : > { %637 = shalt.err (!%p634_p12)
}
 0x34e   : > { %525 = dma.vmem_to_hbm [thread:$0]  (%p879_p9), %s822_s26, 128, %s820_s9, %s396_s22  }
 0x34f PF: > { %p537_p2 = scmp.ge.s32.totalorder %s676_s21, 2  ;;  %s421_s23 = sand.u32 1, %s664_s18  }
 0x350   : > { %p880_p3 = scmp.ne.s32.totalorder %s873_s29, 0  ;;  %s422_s25 = scalar_lea.sflag [#allocation4], %s421_s23 }
 0x352   : > { %p532_p4 = pnand %p537_p2, %p880_p3 }
 0x354   : > { %659 = dma.done.wait (!%p532_p4), %s422_s25, 128  }
 0x355   : > { %661 = vsyncadd (!%p532_p4), %s422_s25, 4294967168  ;;  %p16_p7 = scmp.ge.s32.totalorder %s737_s24, 4   ;;  %s881_s18 = smov %s668_s19 }
 0x356   : > { %s882_s19 = smov %s672_s20  ;;  %s883_s20 = smov %s748_s27 }
 0x357   : > { %s884_s21 = smov %s737_s24  ;;  %18 = sbr.rel (!%p16_p7) target bundleno = 4 (0x4), region = 80 }
 0x35e   :  { %427 = vsyncpa [#allocation3], 1 }
 0x35f   :  { %429 = vsyncpa [#allocation3 + $0x1], 1 }
 0x360   :  { %430 = vsyncpa [#allocation4], 1 }
 0x361   :  { %432 = vsyncpa [#allocation4 + $0x1], 1 }

// kernel: tpu_custom_call.1
= control target key start
LH: loop header
LB: loop body
LE: loop exit
PB: predicated region body
PF: predicated region fallthrough
CT: control target
= control target key end

     0   :  { %10 = vsyncpa [#allocation3], 0  ;;  %s863_s0 = inlined_call_operand.vmem [shape: f32[16,32], index: 0, kind: input, shape index: {}]   ;;  %s864_s1 = inlined_call_operand.hbm [shape: f32[3,32], index: 1, kind: input, shape index: {}]   ;;  %s865_s2 = inlined_call_operand.vmem [shape: bf16[32,16], index: 2, kind: input, shape index: {}]   ;;  %s866_s3 = inlined_call_operand.vmem [shape: f32[1,16], index: 3, kind: input, shape index: {}]   ;;  %s867_s4 = inlined_call_operand.vmem [shape: bf16[16,32], index: 4, kind: input, shape index: {}]   ;;  %s868_s5 = inlined_call_operand.hbm [shape: f32[16,32], index: 5, kind: output, shape index: {}]  }
   0x1   :  { %11 = vsyncpa [#allocation4], 0 }
   0x2   :  { %13 = vsyncpa [#allocation4 + $0x1], 0  ;;  %s712_s18 = smov 0   ;;  %s714_s19 = smov 0  }
   0x3   :  { %s716_s20 = smov 0   ;;  %s718_s21 = smov 0  }
   0x4 LB: > { %s733_s22 = sadd.s32 4294967295, %s676_s21   ;;  %s480_s23 = sadd.s32 4294967294, %s676_s21   ;;  %s676_s21 = sphi %s718_s21, %s884_s21   ;;  %s672_s20 = sphi %s716_s20, %s883_s20   ;;  %s668_s19 = sphi %s714_s19, %s882_s19   ;;  %s664_s18 = sphi %s712_s18, %s881_s18  }
   0x5   : > { %s737_s24 = sadd.s32 1, %s676_s21   ;;  %s136_s25 = sadd.s32 1, %s672_s20 }
   0x6   : > { %s133_s26 = ssub.s32 %s676_s21, %s737_s24  ;;  %p146_p0 = scmp.ne.s32.totalorder %s672_s20, %s668_s19 }
   0x7   : > { %p134_p1 = scmp.eq.s32.totalorder %s133_s26, 0  ;;  %p147_p2 = scmp.eq.s32.totalorder %s733_s22, 1 }
   0x8   : > { %p152_p3 = scmp.ne.s32.totalorder %s668_s19, %s664_s18  ;;  %p153_p4 = scmp.eq.s32.totalorder %s480_s23, 1 }
   0x9   : > { %s748_s27 = scalar_select %p134_p1, %s672_s20, %s136_s25  }
   0xa   : > { %p750_p5 = por %p147_p2, %p146_p0  ;;  %p754_p6 = por %p153_p4, %p152_p3 }
   0xb   : > { %p481_p7 = scmp.ge.s32.totalorder %s676_s21, 1  ;;  %p160_p8 = scmp.lt.s32.totalorder %s676_s21, 3 }
   0xc   : > { %s872_s28 = scalar_select %p750_p5, 1, 0 }
   0xd   : > { %s873_s29 = scalar_select %p754_p6, 1, 0 }
   0xe   : > { %p869_p9 = scmp.eq.s32.totalorder %s733_s22, 0  ;;  %p761_p10 = pnand %p481_p7, %p160_p8 }
   0xf   : > { %s678_s6 = smov [#allocation2]   ;;  %s582_s11 = scalar_lea.hbm %s864_s1, 64 }
  0x10   : > { %s874_s30 = scalar_select %p761_p10, 1, 0 }
  0x11   : > { %s173_s7 = sshll.u32 %s678_s6, 4  ;;  %p527_p11 = pneg %p761_p10  ;;  %s174_s7 = int_to_ptr.vmem [resolvable:$true] %s173_s7 }
  0x12   : > { %p583_p13 = scmp.ne.s32.totalorder %s864_s1, %s582_s11  ;;  %p589_p3 = scmp.lt.u32.totalorder %s582_s11, %s864_s1 }
  0x13   : > { %p769_p12 = pnand %p869_p9, %p527_p11 }
  0x15   : > { %p584_p0 = pneg %p769_p12 }
  0x17   : > { %p585_p1 = pnand %p584_p0, %p583_p13 }
  0x19   : > { %p586_p2 = pneg %p585_p1 }
  0x1b   : > { %p591_p4 = pnand %p589_p3, %p586_p2 }
  0x1d   : > { %594 = shalt.err (!%p591_p4)
}
  0x1e   : > { %s595_s16 = scalar_lea.vmem %s174_s7, 64  ;;  %p603_p9 = scmp.lt.s32.totalorder %s174_s7, %s174_s7 }
  0x1f   : > { %p596_p7 = scmp.ne.s32.totalorder %s174_s7, %s595_s16  ;;  %p604_p6 = scmp.lt.s32.totalorder %s595_s16, %s595_s16 }
  0x21   : > { %p598_p8 = pnand %p596_p7, %p584_p0  ;;  %p605_p5 = por %p604_p6, %p603_p9 }
  0x23   : > { %p599_p11 = pneg %p598_p8 }
  0x25   : > { %p606_p10 = pnand %p605_p5, %p599_p11 }
  0x27   : > { %609 = shalt.err (!%p606_p10)
}
  0x28   : > { %530 = dma.hbm_to_vmem [thread:$0]  (!%p769_p12), %s864_s1, 64, %s174_s7, [#allocation3]  }
  0x29   : > { %p876_p13 = scmp.ne.s32.totalorder %s874_s30, 0 }
  0x2a   : > { %p877_p1 = scmp.eq.s32.totalorder (!%p876_p13), %s733_s22, 0 }
  0x2b   : > { %202 = sbr.rel (%p876_p13) target bundleno = 847 (0x34f), region = 40 }
  0x32   : > { %655 = dma.done.wait (%p877_p1), [#allocation3], 64   ;;  %p878_p0 = pmov %p877_p1 }
  0x33   : > { %p229_p6 = scmp.lt.s32.totalorder %s733_s22, 1  ;;  %vm235_vm0 = vcmask 261120   ;;  %v573_v7 = vld [vmem:[%s865_s2] sm:$0xff]   ;;  %v679_v8 = vmov 0.0   ;;  %v574_v9 = vld [vmem:[%s865_s2 + $0x8] sm:$0xff]   ;;  %vm680_vm1 = vmmov 0  }
  0x34   : > { %657 = vsyncadd (%p878_p0), [#allocation3], 4294967232  ;;  %507 = vmatprep.subr.bf16.mxu0 %v679_v8  ;;  %515 = vmatprep.subr.bf16.mxu1 %v679_v8  ;;  %v488_v14 = vld [vmem:[#allocation2] ss:$0 sm:$0xff]  ;;  %v489_v16 = vld [vmem:[#allocation2 + $0x1] ss:$0 sm:$0xff] }
  0x35   : > { %s230_s25 = scalar_select %p229_p6, %s733_s22, 1  ;;  %508 = vmatpush3.bf16.msra.mxu0 %v573_v7  ;;  %511 = vmatprep.mubr.msk.bf16.mxu0 %vm680_vm1, %v679_v8  ;;  %v575_v20 = vld [vmem:[%s867_s4] sm:$0xff]   ;;  %vm350_vm2 = vcmask 130048  }
  0x36   : > { %509 = vmatprep.subr.bf16.mxu0 %v679_v8  ;;  %517 = vmatprep.mubr.msk.bf16.mxu1 %vm680_vm1, %v679_v8  ;;  %v490_v21 = vld [vmem:[%s866_s3] ss:$0 sm:$0xff]  ;;  %s226_s16 = sand.u32 1, %s668_s19   ;;  %v495_v34 = vld [vmem:[#allocation2 + $0x2] ss:$0 sm:$0xff]  ;;  %s499_s23 = sshll.u32 %s733_s22, 7 }
  0x37   : > { %s487_s26 = sshll.u32 %s230_s25, 3  ;;  %516 = vmatpush3.bf16.msra.mxu1 %v575_v20  ;;  %s486_s17 = sshll.u32 %s226_s16, 3 }
  0x38   : > { %s232_s9 = scalar_lea.vmem %s863_s0, %s487_s26  ;;  %s228_s25 = scalar_lea.vmem [#allocation5], %s486_s17 }
  0x39   : > { %v234_v0 = vld [vmem:[%s232_s9] sm:$0xff]  ;;  %510 = vmatpush3.bf16.msra.mxu0 %v574_v9  ;;  %s409_s26 = sshll.u32 %s228_s25, 4  ;;  %s820_s9 = scalar_lea.hbm %s868_s5, %s499_s23  ;;  %s822_s26 = int_to_ptr.vmem [resolvable:$true] %s409_s26 }
  0x3a   : > { %v236_v1 = vsel %vm235_vm0, %v234_v0, 0.0  ;;  %s396_s22 = scalar_lea.sflag [#allocation4], %s226_s16  ;;  %s610_s30 = scalar_lea.vmem %s822_s26, 128 }
  0x3b   : > { %237 = vadd.xlane.f32.xlu0 %v236_v1  ;;  %p611_p5 = scmp.ne.s32.totalorder %s822_s26, %s610_s30  ;;  %p879_p9 = scmp.ne.s32.totalorder %s872_s28, 0 }
  0x3c   : > { %s681_s7 = smov [#allocation5]  }
  0x3d   : > { %p612_p10 = pnand %p611_p5, %p879_p9  ;;  %s614_s10 = sshll.u32 %s681_s7, 4  ;;  %s615_s10 = int_to_ptr.vmem [resolvable:$false] %s614_s10 }
  0x3e   : > { %s616_s11 = scalar_lea.vmem %s615_s10, 256  ;;  %p617_p2 = scmp.lt.s32.totalorder %s822_s26, %s615_s10 }
  0x3f   : > { %p613_p12 = pneg %p612_p10  ;;  %p618_p3 = scmp.lt.s32.totalorder %s616_s11, %s610_s30 }
  0x41   : > { %p619_p4 = por %p618_p3, %p617_p2 }
  0x43   : > { %p620_p7 = pnand %p619_p4, %p613_p12 }
  0xc8   : > { %v238_v2 = vpop.xlane.xlu0 %237 }
  0xc9   : > { %v239_v3 = vmul.f32 0.03125, %v238_v2 }
  0xcb   : > { %v240_v4 = vsub.f32 %v234_v0, %v239_v3 }
  0xcd   : > { %v241_v5 = vmul.f32 %v240_v4, %v240_v4 }
  0xcf   : > { %v242_v6 = vsel %vm235_vm0, %v241_v5, 0.0 }
  0xd0   : > { %243 = vadd.xlane.f32.xlu0 %v242_v6 }
 0x15d   : > { %v244_v10 = vpop.xlane.xlu0 %243 }
 0x15e   : > { %v245_v11 = vmul.f32 0.03125, %v244_v10 }
 0x160   : > { %v246_v12 = vadd.f32 1e-05, %v245_v11 }
 0x162   : > { %576 = vrsqrt.f32 %v246_v12 }
 0x16c   : > { %v577_v13 = vpop.eup %576 }
 0x16d   : > { %v248_v15 = vmul.f32 %v577_v13, %v240_v4 }
 0x16f   : > { %v254_v17 = vmul.f32 %v488_v14, %v248_v15 }
 0x171   : > { %v260_v18 = vadd.f32 %v489_v16, %v254_v17 }
 0x173   : > { %v261_v19 = vpack.c.bf16 %v260_v18, %v260_v18 }
 0x175   : > { %512 = vmatmul.mubr.msk.bf16.vlgmr.msra.gmra.mrb[0].mxu0 %vm235_vm0, %v261_v19 }
 0x248   : > { %v322_v22 = vpop.f32.mrb[0].mxu0 }
 0x249   : > { %v323_v23 = vadd.f32 %v490_v21, %v322_v22  ;;  %v513_v24 = vpop.f32.mrb[1].mxu0 }
 0x24a   : > { %v325_v25 = vpop.f32.mrb[2].mxu0 }
 0x24b   : > { %v494_v26 = vmul.f32 -1.702, %v323_v23  ;;  %v514_v27 = vpop.f32.mrb[3].mxu0 }
 0x24d   : > { %v330_v28 = vmul.f32 1.442695, %v494_v26 }
 0x24f   : > { %578 = vpow2.f32 %v330_v28 }
 0x259   : > { %v579_v29 = vpop.eup %578 }
 0x25a   : > { %v332_v30 = vadd.f32 1.0, %v579_v29 }
 0x25c   : > { %580 = vrcp.f32 %v332_v30 }
 0x266   : > { %v581_v31 = vpop.eup %580 }
 0x267   : > { %v335_v32 = vmul.f32 %v581_v31, %v323_v23 }
 0x269   : > { %v336_v33 = vpack.c.bf16 %v335_v32, %v335_v32 }
 0x26b   : > { %518 = vmatmul.mubr.msk.bf16.vlgmr.msra.gmra.mrb[0].mxu1 %vm350_vm2, %v336_v33 }
 0x33e   : > { %v388_v35 = vpop.f32.mrb[0].mxu1 }
 0x33f   : > { %v389_v36 = vadd.f32 %v495_v34, %v388_v35  ;;  %v519_v37 = vpop.f32.mrb[1].mxu1 }
 0x340   : > { %v391_v38 = vpop.f32.mrb[2].mxu1 }
 0x341   : > { %v520_v39 = vpop.f32.mrb[3].mxu1  ;;  %394 = vst.msk [vmem:[%s228_s25] sm:$0xff] %vm235_vm0, %v389_v36 }
 0x342   : > { %623 = shalt.err (!%p620_p7)
}
 0x343   : > { %s624_s12 = scalar_lea.hbm %s820_s9, 128  ;;  %s628_s15 = scalar_lea.hbm %s868_s5, 256 }
 0x344   : > { %p625_p8 = scmp.ne.s32.totalorder %s820_s9, %s624_s12  ;;  %p629_p1 = scmp.lt.u32.totalorder %s820_s9, %s868_s5 }
 0x345   : > { %p630_p0 = scmp.lt.u32.totalorder %s628_s15, %s624_s12  ;;  %p632_p5 = scmp.lt.u32.totalorder %s624_s12, %s820_s9 }
 0x346   : > { %p626_p11 = pnand %p625_p8, %p879_p9 }
 0x347   : > { %p631_p6 = por %p630_p0, %p629_p1 }
 0x348   : > { %p627_p13 = pneg %p626_p11 }
 0x349   : > { %p633_p10 = por %p632_p5, %p631_p6 }
 0x34b   : > { %p634_p12 = pnand %p633_p10, %p627_p13 }
 0x34d   : > { %637 = shalt.err (!%p634_p12)
}
 0x34e   : > { %525 = dma.vmem_to_hbm [thread:$0]  (%p879_p9), %s822_s26, 128, %s820_s9, %s396_s22  }
 0x34f PF: > { %p537_p2 = scmp.ge.s32.totalorder %s676_s21, 2  ;;  %s421_s23 = sand.u32 1, %s664_s18  }
 0x350   : > { %p880_p3 = scmp.ne.s32.totalorder %s873_s29, 0  ;;  %s422_s25 = scalar_lea.sflag [#allocation4], %s421_s23 }
 0x352   : > { %p532_p4 = pnand %p537_p2, %p880_p3 }
 0x354   : > { %659 = dma.done.wait (!%p532_p4), %s422_s25, 128  }
 0x355   : > { %661 = vsyncadd (!%p532_p4), %s422_s25, 4294967168  ;;  %p16_p7 = scmp.ge.s32.totalorder %s737_s24, 4   ;;  %s881_s18 = smov %s668_s19 }
 0x356   : > { %s882_s19 = smov %s672_s20  ;;  %s883_s20 = smov %s748_s27 }
 0x357   : > { %s884_s21 = smov %s737_s24  ;;  %18 = sbr.rel (!%p16_p7) target bundleno = 4 (0x4), region = 80 }
 0x35e   :  { %427 = vsyncpa [#allocation3], 1 }
 0x35f   :  { %429 = vsyncpa [#allocation3 + $0x1], 1 }
 0x360   :  { %430 = vsyncpa [#allocation4], 1 }
 0x361   :  { %432 = vsyncpa [#allocation4 + $0x1], 1 }

</bundles_post_ra>
